<compile_context>
chip_gen: v7x
topology: tpu7x:2x2x1
jax: 0.10.0
libtpu: 0.0.40
codegen_flags: <defaults>
</compile_context>

<pallas_src>
import jax
import jax.numpy as jnp
from jax.experimental import pallas as pl
from jax.experimental.pallas import tpu as pltpu


def container_chain_kernel(x_ref, w1_ref, b1_ref, w2_ref, b2_ref, o_ref):
    # "encoder" container: Linear + ReLU (f32 accumulation, f32 epilogue).
    h = jnp.dot(x_ref[...], w1_ref[...], preferred_element_type=jnp.float32)
    h = h + b1_ref[...]                      # (1, H) broadcasts over rows
    h = jnp.maximum(h, 0.0)
    # "predictor" container: Linear.  Cast activations to the weight dtype so
    # the second matmul also takes the native MXU path (no-op when f32).
    y = jnp.dot(h.astype(w2_ref.dtype), w2_ref[...],
                preferred_element_type=jnp.float32)
    y = y + b2_ref[...]
    o_ref[...] = y.astype(o_ref.dtype)


def _round_up(n, m):
    return ((n + m - 1) // m) * m


def module_container_forward(x, w1, b1, w2, b2, *, tile_b=None, mxu_dtype=None):
    """Fused forward of the encoder -> predictor container chain.

    tile_b:    batch tile.  None -> single block if B <= 256, else 256.
    mxu_dtype: optional narrower dtype (e.g. jnp.bfloat16) for the matmul
               operands (x, W1, W2).  Accumulation / bias / ReLU stay f32.
    """
    B, D_in = x.shape
    H = w1.shape[1]
    D_out = w2.shape[1]
    out_dtype = x.dtype

    # Lane-dense output: pad the output feature dim to a multiple of 128 so
    # the output store is an unmasked full-lane vst (pad sliced off below).
    D_pad = _round_up(D_out, 128)
    if D_pad != D_out:
        w2 = jnp.pad(w2, ((0, 0), (0, D_pad - D_out)))
        b2 = jnp.pad(b2, ((0, 0), (0, D_pad - D_out)))

    # Optional bf16 MXU operands (v6e / v7x).  Biases stay f32 so the
    # bias-add / ReLU epilogue remains on the f32 VPU path (v5e-friendly).
    if mxu_dtype is not None:
        x = x.astype(mxu_dtype)
        w1 = w1.astype(mxu_dtype)
        w2 = w2.astype(mxu_dtype)
    b1 = b1.astype(jnp.float32)
    b2 = b2.astype(jnp.float32)

    if tile_b is None:
        tile_b = B if B <= 256 else 256

    if tile_b >= B:
        # Single block: whole problem resident in VMEM, no grid, no
        # pipelining machinery, no double-buffered weight copies.
        out = pl.pallas_call(
            container_chain_kernel,
            out_shape=jax.ShapeDtypeStruct((B, D_pad), out_dtype),
        )(x, w1, b1, w2, b2)
        return out[:, :D_out] if D_pad != D_out else out

    # Batch-tiled path for large B.  Pad the batch to the tile boundary so
    # every grid step runs a full, unmasked tile.
    B_pad = _round_up(B, tile_b)
    if B_pad != B:
        x = jnp.pad(x, ((0, B_pad - B), (0, 0)))

    # Weights / biases use a constant index_map so they stay resident in VMEM
    # across grid steps; the batch axis is "parallel" so v7x's two
    # TensorCores split the grid.
    # TODO(synk): for production-sized weights on v7x (64 MiB VMEM), consider
    # pipeline_mode=pl.Buffered(1) on the grid-invariant weight specs to
    # avoid double-buffering them.
    grid = (B_pad // tile_b,)
    out = pl.pallas_call(
        container_chain_kernel,
        out_shape=jax.ShapeDtypeStruct((B_pad, D_pad), out_dtype),
        grid_spec=pl.GridSpec(
            grid=grid,
            in_specs=[
                pl.BlockSpec((tile_b, D_in), lambda i: (i, 0)),  # x tile
                pl.BlockSpec((D_in, H),      lambda i: (0, 0)),  # W1
                pl.BlockSpec((1, H),         lambda i: (0, 0)),  # b1
                pl.BlockSpec((H, D_pad),     lambda i: (0, 0)),  # W2
                pl.BlockSpec((1, D_pad),     lambda i: (0, 0)),  # b2
            ],
            out_specs=pl.BlockSpec((tile_b, D_pad), lambda i: (i, 0)),
        ),
        compiler_params=pltpu.CompilerParams(
            dimension_semantics=("parallel",)),
    )(x, w1, b1, w2, b2)

    if B_pad != B:
        out = out[:B]
    return out[:, :D_out] if D_pad != D_out else out


if __name__ == "__main__":
    # Small shapes implied by the module: observation dim, hidden dim, action dim.
    B, D_IN, H, D_OUT = 16, 32, 128, 16

    key = jax.random.PRNGKey(0)
    kx, k1, k2, k3, k4, kb = jax.random.split(key, 6)

    x = jax.random.normal(kx, (B, D_IN), dtype=jnp.float32)
    # Deterministic parameter init (synthetic; no checkpoint load).
    w1 = jax.random.normal(k1, (D_IN, H), dtype=jnp.float32) * 0.05
    b1 = jax.random.normal(k2, (1, H), dtype=jnp.float32) * 0.01
    w2 = jax.random.normal(k3, (H, D_OUT), dtype=jnp.float32) * 0.05
    b2 = jax.random.normal(k4, (1, D_OUT), dtype=jnp.float32) * 0.01

    # --- small-batch f32 path: single block, checked vs. pure-JAX reference.
    out = jax.block_until_ready(module_container_forward(x, w1, b1, w2, b2))
    ref = jnp.maximum(x @ w1 + b1, 0.0) @ w2 + b2
    assert out.shape == (B, D_OUT)
    assert jnp.allclose(out, ref, atol=1e-5, rtol=1e-5)

    # --- large-batch bf16-MXU path: batch-tiled grid (parallel axis), weights
    # resident, checked vs. a reference using the same bf16-operand semantics.
    B_BIG = 512
    x_big = jax.random.normal(kb, (B_BIG, D_IN), dtype=jnp.float32)
    out_big = jax.block_until_ready(
        module_container_forward(x_big, w1, b1, w2, b2,
                                 tile_b=256, mxu_dtype=jnp.bfloat16))
    xb, w1b, w2b = (x_big.astype(jnp.bfloat16), w1.astype(jnp.bfloat16),
                    w2.astype(jnp.bfloat16))
    h_ref = jnp.maximum(
        jnp.dot(xb, w1b, preferred_element_type=jnp.float32) + b1, 0.0)
    ref_big = jnp.dot(h_ref.astype(jnp.bfloat16), w2b,
                      preferred_element_type=jnp.float32) + b2
    assert out_big.shape == (B_BIG, D_OUT)
    assert jnp.allclose(out_big, ref_big, atol=2e-2, rtol=2e-2)

    # --- non-divisible batch exercises the zero-pad + slice path.
    B_ODD = 300
    x_odd = jax.random.normal(kb, (B_ODD, D_IN), dtype=jnp.float32)
    out_odd = jax.block_until_ready(
        module_container_forward(x_odd, w1, b1, w2, b2, tile_b=256))
    ref_odd = jnp.maximum(x_odd @ w1 + b1, 0.0) @ w2 + b2
    assert out_odd.shape == (B_ODD, D_OUT)
    assert jnp.allclose(out_odd, ref_odd, atol=1e-5, rtol=1e-5)

    # TODO(synk): the generic reset_<container>() / create_subset() machinery
    # is module-construction plumbing with no kernel equivalent; only
    # forward() is implemented here.
    print("KERNEL_OK")
</pallas_src>

<mosaic_0001>
module attributes {stable_mosaic.version = 11 : i64} {
  func.func @container_chain_kernel(%arg0: memref<16x32xf32, #tpu.memory_space<vmem>>, %arg1: memref<32x128xf32, #tpu.memory_space<vmem>>, %arg2: memref<1x128xf32, #tpu.memory_space<vmem>>, %arg3: memref<128x128xf32, #tpu.memory_space<vmem>>, %arg4: memref<1x128xf32, #tpu.memory_space<vmem>>, %arg5: memref<16x128xf32, #tpu.memory_space<vmem>>) attributes {dimension_semantics = [], scalar_prefetch = 0 : i64, scratch_operands = 0 : i64, tpu.core_type = #tpu.core_type<tc>} {
    %c0 = arith.constant 0 : index
    %c0_0 = arith.constant 0 : index
    %0 = vector.load %arg0[%c0, %c0_0] : memref<16x32xf32, #tpu.memory_space<vmem>>, vector<16x32xf32>
    %c0_1 = arith.constant 0 : index
    %c0_2 = arith.constant 0 : index
    %1 = vector.load %arg1[%c0_1, %c0_2] : memref<32x128xf32, #tpu.memory_space<vmem>>, vector<32x128xf32>
    %cst = arith.constant dense<0.000000e+00> : vector<16x128xf32>
    %2 = tpu.matmul %0, %1, %cst {dimension_numbers = #tpu.dot_dimension_numbers<[1], [0], [0], [1], [0, 0, 1, 1], [], []>} : vector<16x32xf32>, vector<32x128xf32>, vector<16x128xf32> -> vector<16x128xf32>
    %c0_3 = arith.constant 0 : index
    %c0_4 = arith.constant 0 : index
    %3 = vector.load %arg2[%c0_3, %c0_4] : memref<1x128xf32, #tpu.memory_space<vmem>>, vector<1x128xf32>
    %4 = vector.broadcast %3 : vector<1x128xf32> to vector<16x128xf32>
    %5 = arith.addf %2, %4 : vector<16x128xf32>
    %cst_5 = arith.constant 0.000000e+00 : f32
    %6 = vector.broadcast %cst_5 : f32 to vector<16x128xf32>
    %7 = arith.maximumf %5, %6 : vector<16x128xf32>
    %c0_6 = arith.constant 0 : index
    %c0_7 = arith.constant 0 : index
    %8 = vector.load %arg3[%c0_6, %c0_7] : memref<128x128xf32, #tpu.memory_space<vmem>>, vector<128x128xf32>
    %cst_8 = arith.constant dense<0.000000e+00> : vector<16x128xf32>
    %9 = tpu.matmul %7, %8, %cst_8 {dimension_numbers = #tpu.dot_dimension_numbers<[1], [0], [0], [1], [0, 0, 1, 1], [], []>} : vector<16x128xf32>, vector<128x128xf32>, vector<16x128xf32> -> vector<16x128xf32>
    %c0_9 = arith.constant 0 : index
    %c0_10 = arith.constant 0 : index
    %10 = vector.load %arg4[%c0_9, %c0_10] : memref<1x128xf32, #tpu.memory_space<vmem>>, vector<1x128xf32>
    %11 = vector.broadcast %10 : vector<1x128xf32> to vector<16x128xf32>
    %12 = arith.addf %9, %11 : vector<16x128xf32>
    %c0_11 = arith.constant 0 : index
    %c0_12 = arith.constant 0 : index
    %13 = vector.load %arg5[%c0_11, %c0_12] : memref<16x128xf32, #tpu.memory_space<vmem>>, vector<16x128xf32>
    tpu.vector_store %arg5[%c0_11, %c0_12], %12 {strides = array<i32>} : memref<16x128xf32, #tpu.memory_space<vmem>>, vector<16x128xf32>,
    return
  }
}

</mosaic_0001>

<bundles_post_ra>
// kernel: tpu_custom_call.1
= control target key start
LH: loop header
LB: loop body
LE: loop exit
PB: predicated region body
PF: predicated region fallthrough
CT: control target
= control target key end

     0   :  { %10 = vsyncpa [#allocation3], 0  ;;  %s602_s0 = inlined_call_operand.hbm [shape: f32[16,32], index: 0, kind: input, shape index: {}]   ;;  %s603_s1 = inlined_call_operand.hbm [shape: f32[32,128], index: 1, kind: input, shape index: {}]   ;;  %s604_s2 = inlined_call_operand.vmem [shape: f32[1,128], index: 2, kind: input, shape index: {}]   ;;  %s605_s3 = inlined_call_operand.hbm [shape: f32[128,128], index: 3, kind: input, shape index: {}]   ;;  %s606_s4 = inlined_call_operand.vmem [shape: f32[1,128], index: 4, kind: input, shape index: {}]   ;;  %s607_s5 = inlined_call_operand.hbm [shape: f32[16,128], index: 5, kind: output, shape index: {}]  }
   0x1   :  { %11 = vsyncpa [#allocation6], 0 }
   0x2   :  { %12 = vsyncpa [#allocation4], 0  ;;  %s491_s18 = smov [#allocation5]   ;;  %s492_s20 = smov [#allocation2]  }
   0x3   :  { %s30_s19 = sshll.u32 %s491_s18, 4  ;;  %s18_s21 = sshll.u32 %s492_s20, 4  ;;  %s31_s19 = int_to_ptr.vmem [resolvable:$true] %s30_s19  ;;  %s527_s21 = int_to_ptr.vmem [resolvable:$true] %s18_s21 }
   0x4   :  { %s397_s24 = scalar_lea.hbm %s603_s1, 512 }
   0x5   :  { %p398_p0 = scmp.ne.s32.totalorder %s603_s1, %s397_s24  ;;  %p401_p1 = scmp.lt.u32.totalorder %s397_s24, %s603_s1 }
   0x7   :  { %p403_p2 = pnand %p401_p1, %p398_p0 }
   0x9   :  { %406 = shalt.err (!%p403_p2)
}
   0xa   :  { %s407_s29 = scalar_lea.vmem %s31_s19, 512  ;;  %p412_p4 = scmp.lt.s32.totalorder %s31_s19, %s31_s19 }
   0xb   :  { %p408_p3 = scmp.ne.s32.totalorder %s31_s19, %s407_s29  ;;  %p413_p5 = scmp.lt.s32.totalorder %s407_s29, %s407_s29 }
   0xd   :  { %p414_p6 = por %p413_p5, %p412_p4 }
   0xf   :  { %p415_p7 = pnand %p414_p6, %p408_p3 }
  0x11   :  { %418 = shalt.err (!%p415_p7)
}
  0x12   :  { %s493_s30 = smov 128   ;;  %s494_s6 = smov 8  }
  0x13   :  { %36 = dma.hbm_to_vmem [thread:$0]  %s603_s1, 512, %s31_s19, [#allocation6], %s493_s30, %s493_s30, %s494_s6  }
  0x14   :  { %s419_s11 = scalar_lea.hbm %s602_s0, 256 }
  0x15   :  { %p420_p8 = scmp.ne.s32.totalorder %s602_s0, %s419_s11  ;;  %p423_p9 = scmp.lt.u32.totalorder %s419_s11, %s602_s0 }
  0x17   :  { %p425_p10 = pnand %p423_p9, %p420_p8 }
  0x19   :  { %428 = shalt.err (!%p425_p10)
}
  0x1a   :  { %s429_s16 = scalar_lea.vmem %s527_s21, 256  ;;  %p434_p12 = scmp.lt.s32.totalorder %s527_s21, %s527_s21 }
  0x1b   :  { %p430_p11 = scmp.ne.s32.totalorder %s527_s21, %s429_s16  ;;  %p435_p13 = scmp.lt.s32.totalorder %s429_s16, %s429_s16 }
  0x1d   :  { %p436_p0 = por %p435_p13, %p434_p12 }
  0x1f   :  { %p437_p1 = pnand %p436_p0, %p430_p11 }
  0x21   :  { %440 = shalt.err (!%p437_p1)
}
  0x22   :  { %24 = dma.hbm_to_vmem [thread:$0]  %s602_s0, 256, %s527_s21, [#allocation3], %s493_s30, %s493_s30, %s494_s6  }
  0x23   :  { %s495_s18 = smov [#allocation7]   ;;  %s441_s23 = scalar_lea.hbm %s605_s3, 2048 }
  0x24   :  { %s44_s19 = sshll.u32 %s495_s18, 4  ;;  %p442_p2 = scmp.ne.s32.totalorder %s605_s3, %s441_s23  ;;  %s45_s19 = int_to_ptr.vmem [resolvable:$true] %s44_s19 }
  0x25   :  { %p445_p3 = scmp.lt.u32.totalorder %s441_s23, %s605_s3 }
  0x27   :  { %p447_p4 = pnand %p445_p3, %p442_p2 }
  0x29   :  { %450 = shalt.err (!%p447_p4)
}
  0x2a   :  { %s451_s28 = scalar_lea.vmem %s45_s19, 2048  ;;  %p456_p6 = scmp.lt.s32.totalorder %s45_s19, %s45_s19 }
  0x2b   :  { %p452_p5 = scmp.ne.s32.totalorder %s45_s19, %s451_s28  ;;  %p457_p7 = scmp.lt.s32.totalorder %s451_s28, %s451_s28 }
  0x2d   :  { %p458_p8 = por %p457_p7, %p456_p6 }
  0x2f   :  { %p459_p9 = pnand %p458_p8, %p452_p5 }
  0x31   :  { %462 = shalt.err (!%p459_p9)
}
  0x32   :  { %50 = dma.hbm_to_vmem [thread:$0]  %s605_s3, 2048, %s45_s19, [#allocation6], %s493_s30, %s493_s30, %s494_s6  }
  0x33   :  { %485 = dma.done.wait [#allocation3], 256  }
  0x34   :  { %486 = vsyncadd [#allocation3], 4294967040 }
  0x35   :  { %487 = dma.done.wait [#allocation6], 2560  }
  0x36   :  { %488 = vsyncadd [#allocation6], 4294964736  ;;  %vm75_vm0 = vcmask 261120   ;;  %v64_v0 = vld [vmem:[#allocation5] sm:$0xff]  ;;  %v65_v1 = vld [vmem:[#allocation5 + $0x8] sm:$0xff]  ;;  %s496_s9 = smov [#allocation8]  }
  0x37   :  { %v66_v2 = vld [vmem:[#allocation5 + $0x10] sm:$0xff]  ;;  %v351_v3 = vpack.c.bf16 %v65_v1, %v64_v0  ;;  %v67_v4 = vld [vmem:[#allocation5 + $0x18] sm:$0xff]  ;;  %v159_v7 = vld [vmem:[#allocation7] sm:$0xff]  ;;  %s264_s10 = sshll.u32 %s496_s9, 4  ;;  %s265_s10 = int_to_ptr.vmem [resolvable:$true] %s264_s10 }
  0x38   :  { %v62_v5 = vld [vmem:[#allocation2] sm:$0xff]  ;;  %v355_v6 = vpack.c.bf16 %v67_v4, %v66_v2  ;;  %v160_v8 = vld [vmem:[#allocation7 + $0x8] sm:$0xff]  ;;  %v162_v11 = vld [vmem:[#allocation7 + $0x18] sm:$0xff]  ;;  %p468_p11 = scmp.lt.s32.totalorder %s265_s10, %s265_s10 }
  0x39   :  { %313 = vmatprep.mubr.msk.f32.mxu0 %vm75_vm0, %v62_v5  ;;  %v161_v9 = vld [vmem:[#allocation7 + $0x10] sm:$0xff]  ;;  %352 = vmatprep.subr.bf16.mxu0 %v351_v3  ;;  %v359_v10 = vpack.c.bf16 %v160_v8, %v159_v7  ;;  %v163_v13 = vld [vmem:[#allocation7 + $0x20] sm:$0xff]  ;;  %v164_v14 = vld [vmem:[#allocation7 + $0x28] sm:$0xff] }
  0x3a   :  { %354 = vmatpush3.bf16.msra.mxu0 %v351_v3  ;;  %v363_v12 = vpack.c.bf16 %v162_v11, %v161_v9  ;;  %v367_v15 = vpack.c.bf16 %v164_v14, %v163_v13  ;;  %v63_v16 = vld [vmem:[#allocation2 + $0x8] sm:$0xff]  ;;  %v165_v17 = vld [vmem:[#allocation7 + $0x30] sm:$0xff]  ;;  %v167_v20 = vld [vmem:[#allocation7 + $0x40] sm:$0xff] }
  0x3b   :  { %356 = vmatprep.subr.bf16.mxu0 %v355_v6  ;;  %360 = vmatprep.subr.bf16.mxu1 %v359_v10  ;;  %v166_v18 = vld [vmem:[#allocation7 + $0x38] sm:$0xff]  ;;  %v168_v21 = vld [vmem:[#allocation7 + $0x48] sm:$0xff]  ;;  %v169_v23 = vld [vmem:[#allocation7 + $0x50] sm:$0xff] }
  0x3c   :  { %362 = vmatpush3.bf16.msra.mxu1 %v359_v10  ;;  %v371_v19 = vpack.c.bf16 %v166_v18, %v165_v17  ;;  %v375_v22 = vpack.c.bf16 %v168_v21, %v167_v20  ;;  %v170_v24 = vld [vmem:[#allocation7 + $0x58] sm:$0xff]  ;;  %v171_v26 = vld [vmem:[#allocation7 + $0x60] sm:$0xff]  ;;  %v172_v27 = vld [vmem:[#allocation7 + $0x68] sm:$0xff] }
  0x3d   :  { %364 = vmatprep.subr.bf16.mxu1 %v363_v12  ;;  %v379_v25 = vpack.c.bf16 %v170_v24, %v169_v23  ;;  %v383_v28 = vpack.c.bf16 %v172_v27, %v171_v26  ;;  %v173_v29 = vld [vmem:[#allocation7 + $0x70] sm:$0xff]  ;;  %v174_v30 = vld [vmem:[#allocation7 + $0x78] sm:$0xff] }
  0x3e   :  { %358 = vmatpush3.bf16.msra.mxu0 %v355_v6  ;;  %v387_v31 = vpack.c.bf16 %v174_v30, %v173_v29  ;;  %v277_v32 = vld [vmem:[%s604_s2] ss:$0 sm:$0xff]  ;;  %s463_s2 = scalar_lea.vmem %s265_s10, 256 }
  0x3f   :  { %v280_v39 = vld [vmem:[%s606_s4] ss:$0 sm:$0xff]  ;;  %p464_p10 = scmp.ne.s32.totalorder %s265_s10, %s463_s2  ;;  %p469_p12 = scmp.lt.s32.totalorder %s463_s2, %s463_s2 }
  0x40   :  { %366 = vmatpush3.bf16.msra.mxu1 %v363_v12 }
  0x41   :  { %314 = vmatmul.mubr.msk.f32.vlgmr.msra.gmra.mrb[0].mxu0 %vm75_vm0, %v63_v16  ;;  %368 = vmatprep.subr.bf16.mxu1 %v367_v15  ;;  %p470_p13 = por %p469_p12, %p468_p11 }
  0x43   :  { %p471_p0 = pnand %p470_p13, %p464_p10 }
  0x44   :  { %370 = vmatpush3.bf16.msra.mxu1 %v367_v15 }
  0x45   :  { %372 = vmatprep.subr.bf16.mxu1 %v371_v19 }
  0x48   :  { %374 = vmatpush3.bf16.msra.mxu1 %v371_v19 }
  0x49   :  { %376 = vmatprep.subr.bf16.mxu1 %v375_v22 }
  0x4c   :  { %378 = vmatpush3.bf16.msra.mxu1 %v375_v22 }
  0x4d   :  { %380 = vmatprep.subr.bf16.mxu1 %v379_v25 }
  0x50   :  { %382 = vmatpush3.bf16.msra.mxu1 %v379_v25 }
  0x51   :  { %384 = vmatprep.subr.bf16.mxu1 %v383_v28 }
  0x54   :  { %386 = vmatpush3.bf16.msra.mxu1 %v383_v28 }
  0x55   :  { %388 = vmatprep.subr.bf16.mxu1 %v387_v31 }
  0x58   :  { %390 = vmatpush3.bf16.msra.mxu1 %v387_v31 }
 0x114   :  { %v315_v33 = vpop.f32.mrb[0].mxu0 }
 0x115   :  { %v154_v34 = vadd.f32 %v315_v33, %v277_v32  ;;  %v148_v35 = vpop.f32.mrb[1].mxu0 }
 0x116   :  { %v149_v36 = vadd.f32 %v277_v32, %v148_v35 }
 0x117   :  { %v158_v38 = vmax.f32 %v154_v34, 0.0 }
 0x118   :  { %v157_v37 = vmax.f32 %v149_v36, 0.0 }
 0x11a   :  { %348 = vmatprep.mubr.f32.mxu1 %v157_v37 }
 0x11b   :  { %349 = vmatmul.mubr.f32.vlgmr.msra.gmra.mrb[0].mxu1 %v158_v38 }
 0x1ee   :  { %v350_v40 = vpop.f32.mrb[0].mxu1 }
 0x1ef   :  { %v254_v41 = vadd.f32 %v350_v40, %v280_v39  ;;  %v248_v42 = vpop.f32.mrb[1].mxu1 }
 0x1f0   :  { %v249_v43 = vadd.f32 %v280_v39, %v248_v42 }
 0x1f1   :  { %258 = vst [vmem:[#allocation8 + $0x8] sm:$0xff] %v254_v41 }
 0x1f2   :  { %257 = vst [vmem:[#allocation8] sm:$0xff] %v249_v43 }
 0x1f3   :  { %474 = shalt.err (!%p471_p0)
}
 0x1f4   :  { %s475_s4 = scalar_lea.hbm %s607_s5, 256 }
 0x1f5   :  { %p476_p1 = scmp.ne.s32.totalorder %s607_s5, %s475_s4  ;;  %p479_p2 = scmp.lt.u32.totalorder %s475_s4, %s607_s5 }
 0x1f7   :  { %p481_p3 = pnand %p479_p2, %p476_p1 }
 0x1f9   :  { %484 = shalt.err (!%p481_p3)
}
 0x1fa   :  { %270 = dma.vmem_to_hbm [thread:$0]  %s265_s10, 256, %s607_s5, [#allocation4], %s493_s30, %s493_s30, %s494_s6  }
 0x1fb   :  { %489 = dma.done.wait [#allocation4], 256  }
 0x1fc   :  { %490 = vsyncadd [#allocation4], 4294967040 }
 0x1fd   :  { %274 = vsyncpa [#allocation3], 1 }
 0x1fe   :  { %275 = vsyncpa [#allocation6], 1 }
 0x1ff   :  { %276 = vsyncpa [#allocation4], 1 }

</bundles_post_ra>
